<compile_context>
chip_gen: v6e
topology: v6e:2x2x1
jax: 0.10.0
libtpu: 0.0.40
codegen_flags: <defaults>
</compile_context>

<pallas_src>
import functools

import jax
import jax.numpy as jnp
from jax.experimental import pallas as pl
from jax.experimental.pallas import tpu as pltpu

P1 = 0.8                                   # first dropout prob  (keep 0.2)
P2 = 0.7                                   # second dropout prob (keep 0.3)
# Keep iff uniform uint32 bits < (1 - p) * 2^32.  Python ints, NOT jnp arrays.
# NOTE: int((1-p)*2**32) would wrap to 0 for p == 0; clamp if p becomes configurable.
_T1 = int((1.0 - P1) * float(1 << 32))     # 858993459
_T2 = int((1.0 - P2) * float(1 << 32))     # 1288490188
_S1 = 1.0 / (1.0 - P1)                     # 5.0
_S2 = 1.0 / (1.0 - P2)                     # 3.333...


def _dropout_chain_kernel(rng_ref, wx_ref, o_ref, *, in_kernel_prng):
    """rng_ref: (1,) int32 seed in SMEM   (or (2, n) uint32 bits in VMEM when
    in_kernel_prng=False).   wx_ref: (2, n) f32 [param_row ; x2_row].
    o_ref: (2, n) f32 [x1_out ; x2_out]."""
    n = wx_ref.shape[-1]
    s = wx_ref[0:1, :] + wx_ref[1:2, :]                    # param + x2, (1, n)

    if in_kernel_prng:
        pltpu.prng_seed(rng_ref[0])
        raw = pltpu.prng_random_bits((2, n))
        bits = jax.lax.bitcast_convert_type(raw, jnp.uint32)
    else:
        bits = rng_ref[...]                                # (2, n) uint32

    keep1 = bits[0:1, :] < _T1
    keep2 = bits[1:2, :] < _T2
    d1 = jnp.where(keep1, s * _S1, 0.0)                    # dropout(s,  p=0.8)
    d2 = jnp.where(keep2, d1 * _S2, 0.0)                   # dropout(d1, p=0.7)

    # Direct row stores (no concat): row 0 = returned x1 (second dropout),
    #                                row 1 = returned x2 (first dropout).
    o_ref[0:1, :] = d2
    o_ref[1:2, :] = d1


def model_forward(param, x2, seed=0):
    """param: (n,) f32, x2: (1, n) f32, seed: int -> (x1, x2), each (1, n)."""
    x2 = x2.astype(jnp.float32)
    wx = jnp.concatenate(
        [param.reshape(1, -1).astype(jnp.float32), x2], axis=0)   # (2, n) slab
    n = wx.shape[-1]
    out_shape = jax.ShapeDtypeStruct((2, n), jnp.float32)
    vmem = pl.BlockSpec(memory_space=pltpu.MemorySpace.VMEM)

    try:
        # Preferred path: in-kernel hardware PRNG, scalar seed via SMEM.
        out = pl.pallas_call(
            functools.partial(_dropout_chain_kernel, in_kernel_prng=True),
            out_shape=out_shape,
            in_specs=[pl.BlockSpec(memory_space=pltpu.MemorySpace.SMEM), vmem],
            out_specs=vmem,
        )(jnp.array([seed], dtype=jnp.int32), wx)
        out = jax.block_until_ready(out)
    except Exception:
        # Fallback (e.g. interpret mode without PRNG lowering): host-drawn bits.
        bits = jax.random.bits(jax.random.PRNGKey(seed), (2, n), dtype=jnp.uint32)
        out = pl.pallas_call(
            functools.partial(_dropout_chain_kernel, in_kernel_prng=False),
            out_shape=out_shape,
            in_specs=[vmem, vmem],
            out_specs=vmem,
        )(bits, wx)

    return out[0:1, :], out[1:2, :]


if __name__ == "__main__":
    key = jax.random.PRNGKey(0)
    k_param, k_x = jax.random.split(key, 2)

    # Shapes from the module: param (10,), x2 (1, 10).
    param = jax.random.normal(k_param, (10,), dtype=jnp.float32)
    x2 = jax.random.normal(k_x, (1, 10), dtype=jnp.float32)

    x1_out, x2_out = model_forward(param, x2, seed=1234)
    jax.block_until_ready((x1_out, x2_out))

    assert x1_out.shape == (1, 10) and x2_out.shape == (1, 10)

    # Dropout-chain invariants (hold for either RNG path, guards against a
    # silent output-row swap):
    #   kept entries of x2_out equal (param + x2) * 5,
    #   kept entries of x1_out equal x2_out / 0.3.
    s_ref = param.reshape(1, -1) + x2
    err1 = jnp.where(x2_out != 0, jnp.abs(x2_out - s_ref * _S1), 0.0)
    err2 = jnp.where(x1_out != 0, jnp.abs(x1_out - x2_out * _S2), 0.0)
    assert float(jnp.max(err1)) < 1e-4 and float(jnp.max(err2)) < 1e-4
    assert bool(jnp.all(jnp.isfinite(x1_out))) and bool(jnp.all(jnp.isfinite(x2_out)))

    print("KERNEL_OK")
</pallas_src>

<mosaic_0001>
module attributes {stable_mosaic.version = 11 : i64} {
  func.func @_dropout_chain_kernel(%arg0: memref<1xi32, #tpu.memory_space<smem>>, %arg1: memref<2x10xf32, #tpu.memory_space<vmem>>, %arg2: memref<2x10xf32, #tpu.memory_space<vmem>>) attributes {dimension_semantics = [], scalar_prefetch = 0 : i64, scratch_operands = 0 : i64, tpu.core_type = #tpu.core_type<tc>} {
    %c0 = arith.constant 0 : index
    %c0_0 = arith.constant 0 : index
    %0 = vector.load %arg1[%c0, %c0_0] : memref<2x10xf32, #tpu.memory_space<vmem>>, vector<1x10xf32>
    %c1 = arith.constant 1 : index
    %c0_1 = arith.constant 0 : index
    %1 = vector.load %arg1[%c1, %c0_1] : memref<2x10xf32, #tpu.memory_space<vmem>>, vector<1x10xf32>
    %2 = arith.addf %0, %1 : vector<1x10xf32>
    %c0_2 = arith.constant 0 : index
    %3 = memref.load %arg0[%c0_2] : memref<1xi32, #tpu.memory_space<smem>>
    "tpu.prng_set_seed_32"(%3) : (i32) -> ()
    %4 = "tpu.prng_random_bits"() : () -> vector<2x10xi32>
    %5 = tpu.bitcast %4 : vector<2x10xi32> -> vector<2x10xi32>
    %6 = vector.extract_strided_slice %5 {offsets = [0, 0], sizes = [1, 10], strides = [1, 1]} : vector<2x10xi32> to vector<1x10xi32>
    %c858993459_i32 = arith.constant 858993459 : i32
    %7 = vector.broadcast %c858993459_i32 : i32 to vector<1x10xi32>
    %8 = arith.cmpi ult, %6, %7 : vector<1x10xi32>
    %9 = vector.extract_strided_slice %5 {offsets = [1, 0], sizes = [1, 10], strides = [1, 1]} : vector<2x10xi32> to vector<1x10xi32>
    %c1288490188_i32 = arith.constant 1288490188 : i32
    %10 = vector.broadcast %c1288490188_i32 : i32 to vector<1x10xi32>
    %11 = arith.cmpi ult, %9, %10 : vector<1x10xi32>
    %cst = arith.constant 5.000000e+00 : f32
    %12 = vector.broadcast %cst : f32 to vector<1x10xf32>
    %13 = arith.mulf %2, %12 : vector<1x10xf32>
    %cst_3 = arith.constant 0.000000e+00 : f32
    %14 = vector.broadcast %cst_3 : f32 to vector<1x10xf32>
    %15 = arith.select %8, %13, %14 : vector<1x10xi1>, vector<1x10xf32>
    %cst_4 = arith.constant 3.33333325 : f32
    %16 = vector.broadcast %cst_4 : f32 to vector<1x10xf32>
    %17 = arith.mulf %15, %16 : vector<1x10xf32>
    %cst_5 = arith.constant 0.000000e+00 : f32
    %18 = vector.broadcast %cst_5 : f32 to vector<1x10xf32>
    %19 = arith.select %11, %17, %18 : vector<1x10xi1>, vector<1x10xf32>
    %c0_6 = arith.constant 0 : index
    %c0_7 = arith.constant 0 : index
    %20 = vector.load %arg2[%c0_6, %c0_7] : memref<2x10xf32, #tpu.memory_space<vmem>>, vector<1x10xf32>
    tpu.vector_store %arg2[%c0_6, %c0_7], %19 {strides = array<i32>} : memref<2x10xf32, #tpu.memory_space<vmem>>, vector<1x10xf32>,
    %c1_8 = arith.constant 1 : index
    %c0_9 = arith.constant 0 : index
    %21 = vector.load %arg2[%c1_8, %c0_9] : memref<2x10xf32, #tpu.memory_space<vmem>>, vector<1x10xf32>
    tpu.vector_store %arg2[%c1_8, %c0_9], %15 {strides = array<i32>} : memref<2x10xf32, #tpu.memory_space<vmem>>, vector<1x10xf32>,
    return
  }
}

module attributes {stable_mosaic.version = 11 : i64} {
  func.func @_dropout_chain_kernel(%arg0: memref<2x10xi32, #tpu.memory_space<vmem>>, %arg1: memref<2x10xf32, #tpu.memory_space<vmem>>, %arg2: memref<2x10xf32, #tpu.memory_space<vmem>>) attributes {dimension_semantics = [], scalar_prefetch = 0 : i64, scratch_operands = 0 : i64, tpu.core_type = #tpu.core_type<tc>} {
    %c0 = arith.constant 0 : index
    %c0_0 = arith.constant 0 : index
    %0 = vector.load %arg1[%c0, %c0_0] : memref<2x10xf32, #tpu.memory_space<vmem>>, vector<1x10xf32>
    %c1 = arith.constant 1 : index
    %c0_1 = arith.constant 0 : index
    %1 = vector.load %arg1[%c1, %c0_1] : memref<2x10xf32, #tpu.memory_space<vmem>>, vector<1x10xf32>
    %2 = arith.addf %0, %1 : vector<1x10xf32>
    %c0_2 = arith.constant 0 : index
    %c0_3 = arith.constant 0 : index
    %3 = vector.load %arg0[%c0_2, %c0_3] : memref<2x10xi32, #tpu.memory_space<vmem>>, vector<2x10xi32>
    %4 = vector.extract_strided_slice %3 {offsets = [0, 0], sizes = [1, 10], strides = [1, 1]} : vector<2x10xi32> to vector<1x10xi32>
    %c858993459_i32 = arith.constant 858993459 : i32
    %5 = vector.broadcast %c858993459_i32 : i32 to vector<1x10xi32>
    %6 = arith.cmpi ult, %4, %5 : vector<1x10xi32>
    %7 = vector.extract_strided_slice %3 {offsets = [1, 0], sizes = [1, 10], strides = [1, 1]} : vector<2x10xi32> to vector<1x10xi32>
    %c1288490188_i32 = arith.constant 1288490188 : i32
    %8 = vector.broadcast %c1288490188_i32 : i32 to vector<1x10xi32>
    %9 = arith.cmpi ult, %7, %8 : vector<1x10xi32>
    %cst = arith.constant 5.000000e+00 : f32
    %10 = vector.broadcast %cst : f32 to vector<1x10xf32>
    %11 = arith.mulf %2, %10 : vector<1x10xf32>
    %cst_4 = arith.constant 0.000000e+00 : f32
    %12 = vector.broadcast %cst_4 : f32 to vector<1x10xf32>
    %13 = arith.select %6, %11, %12 : vector<1x10xi1>, vector<1x10xf32>
    %cst_5 = arith.constant 3.33333325 : f32
    %14 = vector.broadcast %cst_5 : f32 to vector<1x10xf32>
    %15 = arith.mulf %13, %14 : vector<1x10xf32>
    %cst_6 = arith.constant 0.000000e+00 : f32
    %16 = vector.broadcast %cst_6 : f32 to vector<1x10xf32>
    %17 = arith.select %9, %15, %16 : vector<1x10xi1>, vector<1x10xf32>
    %c0_7 = arith.constant 0 : index
    %c0_8 = arith.constant 0 : index
    %18 = vector.load %arg2[%c0_7, %c0_8] : memref<2x10xf32, #tpu.memory_space<vmem>>, vector<1x10xf32>
    tpu.vector_store %arg2[%c0_7, %c0_8], %17 {strides = array<i32>} : memref<2x10xf32, #tpu.memory_space<vmem>>, vector<1x10xf32>,
    %c1_9 = arith.constant 1 : index
    %c0_10 = arith.constant 0 : index
    %19 = vector.load %arg2[%c1_9, %c0_10] : memref<2x10xf32, #tpu.memory_space<vmem>>, vector<1x10xf32>
    tpu.vector_store %arg2[%c1_9, %c0_10], %13 {strides = array<i32>} : memref<2x10xf32, #tpu.memory_space<vmem>>, vector<1x10xf32>,
    return
  }
}

</mosaic_0001>

<bundles_post_ra>
// kernel: tpu_custom_call.1
= control target key start
LH: loop header
LB: loop body
LE: loop exit
PB: predicated region body
PF: predicated region fallthrough
CT: control target
= control target key end

     0   :  { %v17_v0 = vlaneseq  ;;  %s235_s0 = inlined_call_operand.<no memory space> [shape: s32[1], index: 0, kind: input, shape index: {}]   ;;  %s236_s1 = inlined_call_operand.vmem [shape: f32[2,10], index: 1, kind: input, shape index: {}]   ;;  %s237_s2 = inlined_call_operand.hbm [shape: f32[2,10], index: 2, kind: output, shape index: {}]  }
   0x1   :  { %v209_v1 = vstv %s235_s0 }
   0x2   :  { %8 = vsyncpa [#allocation4], 0  ;;  %v21_v2 = vadd.s32 %v209_v1, %v17_v0  ;;  %v19_v17 = vxor.u32 %v209_v1, %v209_v1  ;;  %vm151_vm0 = vcmask 73728   ;;  %s190_s14 = smov [#allocation3]   ;;  %vm149_vm2 = vcmask 74753  }
   0x3   :  { %s159_s15 = sshll.u32 %s190_s14, 4  ;;  %s160_s15 = int_to_ptr.vmem [resolvable:$true] %s159_s15 }
   0x4   :  { %v22_v3 = vadd.s32 %v21_v2, %v21_v2  ;;  %v23_v4 = vshll.u32 %v21_v2, 13  ;;  %v24_v5 = vshrl.u32 %v21_v2, 19  ;;  %v214_v22 = vxor.u32 466688986, %v19_v17  ;;  %p173_p1 = scmp.lt.s32.totalorder %s160_s15, %s160_s15 }
   0x6   :  { %v25_v6 = vor.u32 %v24_v5, %v23_v4 }
   0x8   :  { %v26_v7 = vxor.u32 %v25_v6, %v22_v3 }
   0xa   :  { %v27_v8 = vadd.s32 %v26_v7, %v22_v3  ;;  %v28_v9 = vshll.u32 %v26_v7, 15  ;;  %v29_v10 = vshrl.u32 %v26_v7, 17 }
   0xc   :  { %v30_v11 = vor.u32 %v29_v10, %v28_v9 }
   0xe   :  { %v31_v12 = vxor.u32 %v30_v11, %v27_v8 }
  0x10   :  { %v32_v13 = vadd.s32 %v31_v12, %v27_v8  ;;  %v33_v14 = vshll.u32 %v31_v12, 26  ;;  %v34_v15 = vshrl.u32 %v31_v12, 6 }
  0x12   :  { %v35_v16 = vor.u32 %v34_v15, %v33_v14 }
  0x14   :  { %v36_v18 = vxor.u32 %v35_v16, %v32_v13 }
  0x16   :  { %v37_v19 = vadd.s32 %v36_v18, %v32_v13  ;;  %v38_v20 = vshll.u32 %v36_v18, 6  ;;  %v39_v21 = vshrl.u32 %v36_v18, 26 }
  0x18   :  { %v40_v23 = vor.u32 %v39_v21, %v38_v20  ;;  %v42_v25 = vadd.s32 %v37_v19, %v209_v1 }
  0x1a   :  { %v41_v24 = vxor.u32 %v40_v23, %v37_v19 }
  0x1c   :  { %v43_v26 = vadd.s32 %v41_v24, %v214_v22 }
  0x1e   :  { %v44_v27 = vadd.s32 1, %v43_v26 }
  0x20   :  { %v45_v28 = vadd.s32 %v44_v27, %v42_v25  ;;  %v46_v29 = vshll.u32 %v44_v27, 17  ;;  %v47_v30 = vshrl.u32 %v44_v27, 15 }
  0x22   :  { %v48_v31 = vor.u32 %v47_v30, %v46_v29 }
  0x24   :  { %v49_v32 = vxor.u32 %v48_v31, %v45_v28 }
  0x26   :  { %v50_v33 = vadd.s32 %v49_v32, %v45_v28  ;;  %v51_v34 = vshll.u32 %v49_v32, 29  ;;  %v52_v35 = vshrl.u32 %v49_v32, 3 }
  0x28   :  { %v53_v36 = vor.u32 %v52_v35, %v51_v34 }
  0x2a   :  { %v54_v37 = vxor.u32 %v53_v36, %v50_v33 }
  0x2c   :  { %v55_v38 = vadd.s32 %v54_v37, %v50_v33  ;;  %v56_v39 = vshll.u32 %v54_v37, 16  ;;  %v57_v40 = vshrl.u32 %v54_v37, 16 }
  0x2e   :  { %v58_v41 = vor.u32 %v57_v40, %v56_v39 }
  0x30   :  { %v59_v42 = vxor.u32 %v58_v41, %v55_v38 }
  0x32   :  { %v60_v43 = vadd.s32 %v59_v42, %v55_v38  ;;  %v61_v44 = vshll.u32 %v59_v42, 24  ;;  %v62_v45 = vshrl.u32 %v59_v42, 8 }
  0x34   :  { %v63_v46 = vor.u32 %v62_v45, %v61_v44  ;;  %v65_v48 = vadd.s32 %v60_v43, %v214_v22 }
  0x36   :  { %v64_v47 = vxor.u32 %v63_v46, %v60_v43 }
  0x38   :  { %v66_v49 = vadd.s32 %v64_v47, %v209_v1 }
  0x3a   :  { %v67_v50 = vadd.s32 2, %v66_v49 }
  0x3c   :  { %v68_v51 = vadd.s32 %v67_v50, %v65_v48  ;;  %v69_v52 = vshll.u32 %v67_v50, 13  ;;  %v70_v53 = vshrl.u32 %v67_v50, 19 }
  0x3e   :  { %v71_v54 = vor.u32 %v70_v53, %v69_v52 }
  0x40   :  { %v72_v55 = vxor.u32 %v71_v54, %v68_v51 }
  0x42   :  { %v73_v56 = vadd.s32 %v72_v55, %v68_v51  ;;  %v74_v57 = vshll.u32 %v72_v55, 15  ;;  %v75_v58 = vshrl.u32 %v72_v55, 17  ;;  %v13_v55 = vld [vmem:[%s236_s1] sm:$0x1] }
  0x44   :  { %v76_v59 = vor.u32 %v75_v58, %v74_v57 }
  0x46   :  { %v77_v60 = vxor.u32 %v76_v59, %v73_v56 }
  0x48   :  { %v78_v61 = vadd.s32 %v77_v60, %v73_v56  ;;  %v79_v62 = vshll.u32 %v77_v60, 26  ;;  %v80_v63 = vshrl.u32 %v77_v60, 6  ;;  %v14_v56 = vld [vmem:[%s236_s1 + $0x1] sm:$0x1]  ;;  %s168_s1 = scalar_lea.vmem %s160_s15, 32 }
  0x49   :  { %v15_v59 = vadd.f32 %v14_v56, %v13_v55  ;;  %p169_p0 = scmp.ne.s32.totalorder %s160_s15, %s168_s1  ;;  %p174_p2 = scmp.lt.s32.totalorder %s168_s1, %s168_s1 }
  0x4a   :  { %v81_v0 = vor.u32 %v80_v63, %v79_v62 }
  0x4b   :  { %v142_v62 = vmul.f32 5.0, %v15_v59  ;;  %p175_p3 = por %p174_p2, %p173_p1 }
  0x4c   :  { %v82_v2 = vxor.u32 %v81_v0, %v78_v61 }
  0x4d   :  { %p176_p4 = pnand %p175_p3, %p169_p0 }
  0x4e   :  { %v83_v3 = vadd.s32 %v82_v2, %v78_v61  ;;  %v84_v4 = vshll.u32 %v82_v2, 6  ;;  %v85_v5 = vshrl.u32 %v82_v2, 26 }
  0x50   :  { %v86_v6 = vor.u32 %v85_v5, %v84_v4  ;;  %v88_v8 = vadd.s32 %v83_v3, %v209_v1 }
  0x52   :  { %v87_v7 = vxor.u32 %v86_v6, %v83_v3 }
  0x54   :  { %v89_v9 = vadd.s32 %v87_v7, %v209_v1 }
  0x56   :  { %v90_v10 = vadd.s32 3, %v89_v9 }
  0x58   :  { %v91_v11 = vadd.s32 %v90_v10, %v88_v8  ;;  %v92_v12 = vshll.u32 %v90_v10, 17  ;;  %v93_v13 = vshrl.u32 %v90_v10, 15 }
  0x5a   :  { %v94_v14 = vor.u32 %v93_v13, %v92_v12 }
  0x5c   :  { %v95_v15 = vxor.u32 %v94_v14, %v91_v11 }
  0x5e   :  { %v96_v16 = vadd.s32 %v95_v15, %v91_v11  ;;  %v97_v17 = vshll.u32 %v95_v15, 29  ;;  %v98_v18 = vshrl.u32 %v95_v15, 3 }
  0x60   :  { %v99_v19 = vor.u32 %v98_v18, %v97_v17 }
  0x62   :  { %v100_v20 = vxor.u32 %v99_v19, %v96_v16 }
  0x64   :  { %v101_v21 = vadd.s32 %v100_v20, %v96_v16  ;;  %v102_v23 = vshll.u32 %v100_v20, 16  ;;  %v103_v24 = vshrl.u32 %v100_v20, 16 }
  0x66   :  { %v104_v25 = vor.u32 %v103_v24, %v102_v23 }
  0x68   :  { %v105_v26 = vxor.u32 %v104_v25, %v101_v21 }
  0x6a   :  { %v106_v27 = vadd.s32 %v105_v26, %v101_v21  ;;  %v107_v28 = vshll.u32 %v105_v26, 24  ;;  %v108_v29 = vshrl.u32 %v105_v26, 8 }
  0x6c   :  { %v109_v30 = vor.u32 %v108_v29, %v107_v28  ;;  %v111_v32 = vadd.s32 %v106_v27, %v209_v1 }
  0x6e   :  { %v110_v31 = vxor.u32 %v109_v30, %v106_v27 }
  0x70   :  { %v112_v33 = vadd.s32 %v110_v31, %v214_v22 }
  0x72   :  { %v113_v34 = vadd.s32 4, %v112_v33 }
  0x74   :  { %v114_v35 = vadd.s32 %v113_v34, %v111_v32  ;;  %v115_v36 = vshll.u32 %v113_v34, 13  ;;  %v116_v37 = vshrl.u32 %v113_v34, 19 }
  0x76   :  { %v117_v38 = vor.u32 %v116_v37, %v115_v36 }
  0x78   :  { %v118_v39 = vxor.u32 %v117_v38, %v114_v35 }
  0x7a   :  { %v119_v40 = vadd.s32 %v118_v39, %v114_v35  ;;  %v120_v41 = vshll.u32 %v118_v39, 15  ;;  %v121_v42 = vshrl.u32 %v118_v39, 17 }
  0x7c   :  { %v122_v43 = vor.u32 %v121_v42, %v120_v41 }
  0x7e   :  { %v123_v44 = vxor.u32 %v122_v43, %v119_v40 }
  0x80   :  { %v124_v45 = vadd.s32 %v123_v44, %v119_v40  ;;  %v125_v46 = vshll.u32 %v123_v44, 26  ;;  %v126_v47 = vshrl.u32 %v123_v44, 6 }
  0x82   :  { %v127_v48 = vor.u32 %v126_v47, %v125_v46 }
  0x84   :  { %v128_v49 = vxor.u32 %v127_v48, %v124_v45 }
  0x86   :  { %v129_v50 = vadd.s32 %v128_v49, %v124_v45  ;;  %v130_v51 = vshll.u32 %v128_v49, 6  ;;  %v131_v52 = vshrl.u32 %v128_v49, 26 }
  0x88   :  { %v132_v53 = vor.u32 %v131_v52, %v130_v51  ;;  %v134_v57 = vadd.s32 %v129_v50, %v214_v22 }
  0x8a   :  { %v133_v54 = vxor.u32 %v132_v53, %v129_v50 }
  0x8c   :  { %v135_v58 = vadd.s32 %v133_v54, %v209_v1 }
  0x8e   :  { %v136_v60 = vadd.s32 5, %v135_v58 }
  0x90   :  { %v137_v61 = vxor.u32 %v136_v60, %v134_v57 }
  0x92   :  { %138 = set.rngseed %v137_v61 }
  0x93   :  { %v139_v63 = vrng }
  0x94   :  { %vm140_vm1 = vcmp.lt.u32.totalorder %v139_v63, 858993459  ;;  %vm141_vm3 = vcmp.lt.u32.totalorder %v139_v63, 1288490188 }
  0x95   :  { %v143_v0 = vsel %vm140_vm1, %v142_v62, 0.0 }
  0x96   :  { %v144_v2 = vmul.f32 3.3333333, %v143_v0  ;;  %152 = vst.msk [vmem:[#allocation3 + $0x1] sm:$0x1] %vm151_vm0, %v143_v0 }
  0x98   :  { %v146_v3 = vrot.slane %v144_v2, 7 }
  0x9a   :  { %v148_v22 = vsel %vm141_vm3, %v146_v3, 0.0 }
  0x9b   :  { %150 = vst.msk [vmem:[#allocation3 - $0x1] sm:$0x2] %vm149_vm2, %v148_v22 }
  0x9c   :  { %179 = shalt.err (!%p176_p4)
}
  0x9d   :  { %162 = dma.vmem_to_hbm [thread:$0]  %s160_s15, 32, %s237_s2, [#allocation4]  }
  0x9e   :  { %188 = dma.done.wait [#allocation4], 32  }
  0x9f   :  { %189 = vsyncadd [#allocation4], 4294967264 }
  0xa0   :  { %166 = vsyncpa [#allocation4], 1 }

// kernel: tpu_custom_call.1
= control target key start
LH: loop header
LB: loop body
LE: loop exit
PB: predicated region body
PF: predicated region fallthrough
CT: control target
= control target key end

     0   :  { %7 = vsyncpa [#allocation3], 0  ;;  %s165_s0 = inlined_call_operand.hbm [shape: u32[2,10], index: 0, kind: input, shape index: {}]   ;;  %s166_s1 = inlined_call_operand.hbm [shape: f32[2,10], index: 1, kind: input, shape index: {}]   ;;  %s167_s2 = inlined_call_operand.hbm [shape: f32[2,10], index: 2, kind: output, shape index: {}]  }
   0x1   :  { %8 = vsyncpa [#allocation6], 0 }
   0x2   :  { %9 = vsyncpa [#allocation4], 0  ;;  %s138_s9 = smov [#allocation2]   ;;  %s139_s11 = smov [#allocation5]  }
   0x3   :  { %s16_s10 = sshll.u32 %s138_s9, 4  ;;  %s26_s12 = sshll.u32 %s139_s11, 4  ;;  %s17_s10 = int_to_ptr.vmem [resolvable:$true] %s16_s10  ;;  %s27_s12 = int_to_ptr.vmem [resolvable:$true] %s26_s12 }
   0x4   :  { %s80_s13 = scalar_lea.vmem %s17_s10, 32  ;;  %p85_p1 = scmp.lt.s32.totalorder %s17_s10, %s17_s10 }
   0x5   :  { %p81_p0 = scmp.ne.s32.totalorder %s17_s10, %s80_s13  ;;  %p86_p2 = scmp.lt.s32.totalorder %s80_s13, %s80_s13 }
   0x7   :  { %p87_p3 = por %p86_p2, %p85_p1 }
   0x9   :  { %p88_p4 = pnand %p87_p3, %p81_p0 }
   0xb   :  { %91 = shalt.err (!%p88_p4)
}
   0xc   :  { %19 = dma.hbm_to_vmem [thread:$0]  %s165_s0, 32, %s17_s10, [#allocation3]  }
   0xd   :  { %s100_s16 = scalar_lea.vmem %s27_s12, 32  ;;  %p105_p6 = scmp.lt.s32.totalorder %s27_s12, %s27_s12 }
   0xe   :  { %p101_p5 = scmp.ne.s32.totalorder %s27_s12, %s100_s16  ;;  %p106_p7 = scmp.lt.s32.totalorder %s100_s16, %s100_s16 }
  0x10   :  { %p107_p8 = por %p106_p7, %p105_p6 }
  0x12   :  { %p108_p9 = pnand %p107_p8, %p101_p5 }
  0x14   :  { %111 = shalt.err (!%p108_p9)
}
  0x15   :  { %29 = dma.hbm_to_vmem [thread:$0]  %s166_s1, 32, %s27_s12, [#allocation6]  }
  0x16   :  { %132 = dma.done.wait [#allocation3], 32  }
  0x17   :  { %133 = vsyncadd [#allocation3], 4294967264 }
  0x18   :  { %134 = dma.done.wait [#allocation6], 32  }
  0x19   :  { %135 = vsyncadd [#allocation6], 4294967264  ;;  %v36_v0 = vld [vmem:[#allocation5] sm:$0x1]  ;;  %v37_v1 = vld [vmem:[#allocation5 + $0x1] sm:$0x1] }
  0x1a   :  { %v39_v2 = vld [vmem:[#allocation2] sm:$0x3]  ;;  %v38_v3 = vadd.f32 %v37_v1, %v36_v0  ;;  %vm51_vm1 = vcmask 73728   ;;  %s140_s0 = smov [#allocation7]   ;;  %vm49_vm3 = vcmask 74753  }
  0x1b   :  { %vm40_vm0 = vcmp.lt.u32.totalorder %v39_v2, 858993459  ;;  %s59_s19 = sshll.u32 %s140_s0, 4  ;;  %vm41_vm2 = vcmp.lt.u32.totalorder %v39_v2, 1288490188  ;;  %s60_s19 = int_to_ptr.vmem [resolvable:$true] %s59_s19 }
  0x1c   :  { %v42_v4 = vmul.f32 5.0, %v38_v3  ;;  %s112_s1 = scalar_lea.vmem %s60_s19, 32  ;;  %p117_p11 = scmp.lt.s32.totalorder %s60_s19, %s60_s19 }
  0x1d   :  { %p113_p10 = scmp.ne.s32.totalorder %s60_s19, %s112_s1  ;;  %p118_p12 = scmp.lt.s32.totalorder %s112_s1, %s112_s1 }
  0x1e   :  { %v43_v5 = vsel %vm40_vm0, %v42_v4, 0.0 }
  0x1f   :  { %v44_v6 = vmul.f32 3.3333333, %v43_v5  ;;  %52 = vst.msk [vmem:[#allocation7 + $0x1] sm:$0x1] %vm51_vm1, %v43_v5  ;;  %p119_p13 = por %p118_p12, %p117_p11 }
  0x21   :  { %v46_v7 = vrot.slane %v44_v6, 7  ;;  %p120_p0 = pnand %p119_p13, %p113_p10 }
  0x23   :  { %v48_v8 = vsel %vm41_vm2, %v46_v7, 0.0 }
  0x24   :  { %50 = vst.msk [vmem:[#allocation7 - $0x1] sm:$0x2] %vm49_vm3, %v48_v8 }
  0x25   :  { %123 = shalt.err (!%p120_p0)
}
  0x26   :  { %62 = dma.vmem_to_hbm [thread:$0]  %s60_s19, 32, %s167_s2, [#allocation4]  }
  0x27   :  { %136 = dma.done.wait [#allocation4], 32  }
  0x28   :  { %137 = vsyncadd [#allocation4], 4294967264 }
  0x29   :  { %66 = vsyncpa [#allocation3], 1 }
  0x2a   :  { %67 = vsyncpa [#allocation6], 1 }
  0x2b   :  { %68 = vsyncpa [#allocation4], 1 }

</bundles_post_ra>
